<compile_context>
chip_gen: v7x
topology: tpu7x:2x2x1
jax: 0.10.0
libtpu: 0.0.40
codegen_flags: <defaults>
</compile_context>

<pallas_src>
import jax
import jax.numpy as jnp
from jax.experimental import pallas as pl
from jax.experimental.pallas import tpu as pltpu

n_embd = 24
hidden = 4 * n_embd  # 96

_ROW_ALIGN = 16  # bf16 packed-sublane granularity (safe for f32 as well)


def _round_up(a, b):
    return (a + b - 1) // b * b


def ffn_kernel(x_ref, w1_ref, b1_ref, w2_ref, b2_ref, o_ref):
    # x_ref: (tm, D) f32 ; w1_ref: (D, H) bf16 ; b1_ref: (1, H) f32
    # w2_ref: (H, D) bf16 ; b2_ref: (1, D) f32 ; o_ref: (tm, D) out_dtype
    x = x_ref[...].astype(jnp.bfloat16)            # cast in VMEM, no extra HBM pass
    h = jnp.dot(x, w1_ref[...], preferred_element_type=jnp.float32)
    h = jnp.maximum(h + b1_ref[...], 0.0)          # bias + ReLU in f32
    y = jnp.dot(h.astype(jnp.bfloat16), w2_ref[...],
                preferred_element_type=jnp.float32)
    o_ref[...] = (y + b2_ref[...]).astype(o_ref.dtype)


def prepare_params(w1, b1, w2, b2):
    """One-time parameter prep (hoisted out of the per-call wrapper):
    weights -> bf16 MXU operands, biases -> (1, F) f32 rows."""
    return (w1.astype(jnp.bfloat16),
            jnp.asarray(b1, jnp.float32).reshape(1, -1),
            w2.astype(jnp.bfloat16),
            jnp.asarray(b2, jnp.float32).reshape(1, -1))


def feed_forward(x, w1b, b1f, w2b, b2f, *, tm=4096, out_dtype=jnp.float32):
    """x: (B, T, n_embd) f32 -> (B, T, n_embd). Computes relu(x@w1+b1)@w2+b2."""
    B, T, D = x.shape
    H = w1b.shape[1]
    N = B * T

    # Row tile: large for HBM DMA efficiency, clamped so it (a) never exceeds
    # the row-aligned problem and (b) leaves >=2 grid steps when possible so
    # both v7x TensorCores share the parallel row axis.
    tm = min(tm,
             _round_up(N, _ROW_ALIGN),
             max(_ROW_ALIGN, _round_up(-(-N // 2), _ROW_ALIGN)))
    Np = _round_up(N, tm)

    x2d = x.reshape(N, D).astype(jnp.float32)
    if Np != N:
        # Row pad only (zero rows are computed and discarded); feature dim stays
        # at its true width so there is no lane-pad HBM blow-up.
        x2d = jnp.pad(x2d, ((0, Np - N), (0, 0)))

    grid = (Np // tm,)

    out_bytes = jnp.dtype(out_dtype).itemsize
    flops = 2 * N * (D * H + H * D)
    bytes_accessed = (Np * D * 4                 # x (f32 in)
                      + D * H * 2 + H * D * 2    # weights (bf16, resident)
                      + (H + D) * 4              # biases (f32)
                      + Np * D * out_bytes)      # out

    out = pl.pallas_call(
        ffn_kernel,
        out_shape=jax.ShapeDtypeStruct((Np, D), out_dtype),
        grid_spec=pl.GridSpec(
            grid=grid,
            in_specs=[
                pl.BlockSpec((tm, D), lambda i: (i, 0)),  # x: tiled over rows
                pl.BlockSpec((D, H), lambda i: (0, 0)),   # w1: resident
                pl.BlockSpec((1, H), lambda i: (0, 0)),   # b1: resident
                pl.BlockSpec((H, D), lambda i: (0, 0)),   # w2: resident
                pl.BlockSpec((1, D), lambda i: (0, 0)),   # b2: resident
            ],
            out_specs=pl.BlockSpec((tm, D), lambda i: (i, 0)),
        ),
        compiler_params=pltpu.CompilerParams(
            dimension_semantics=("parallel",)),
        cost_estimate=pl.CostEstimate(flops=flops, transcendentals=0,
                                      bytes_accessed=bytes_accessed),
    )(x2d, w1b, b1f, w2b, b2f)

    return out[:N].reshape(B, T, D)


if __name__ == "__main__":
    key = jax.random.PRNGKey(0)
    kx, k1, kb1, k2, kb2 = jax.random.split(key, 5)

    B, T = 2, 8
    x = jax.random.normal(kx, (B, T, n_embd), dtype=jnp.float32)

    # Deterministic parameter init (matches PyTorch Linear's U(-1/sqrt(in), 1/sqrt(in))).
    bound1 = 1.0 / (n_embd ** 0.5)
    bound2 = 1.0 / (hidden ** 0.5)
    w1 = jax.random.uniform(k1, (n_embd, hidden), jnp.float32, -bound1, bound1)
    b1 = jax.random.uniform(kb1, (1, hidden), jnp.float32, -bound1, bound1)
    w2 = jax.random.uniform(k2, (hidden, n_embd), jnp.float32, -bound2, bound2)
    b2 = jax.random.uniform(kb2, (1, n_embd), jnp.float32, -bound2, bound2)

    # One-time parameter prep (hoisted out of the forward path).
    w1b, b1f, w2b, b2f = prepare_params(w1, b1, w2, b2)

    out = feed_forward(x, w1b, b1f, w2b, b2f)
    jax.block_until_ready(out)

    # Tight check vs. a plain-JAX reference using the SAME bf16 operands + f32 accum.
    xb = x.reshape(-1, n_embd).astype(jnp.bfloat16)
    h_ref = jnp.maximum(
        jnp.dot(xb, w1b, preferred_element_type=jnp.float32) + b1f, 0.0)
    ref_bf16 = (jnp.dot(h_ref.astype(jnp.bfloat16), w2b,
                        preferred_element_type=jnp.float32) + b2f)
    ref_bf16 = ref_bf16.reshape(B, T, n_embd)
    assert jnp.allclose(out, ref_bf16, atol=1e-4, rtol=1e-4), "mismatch vs bf16 reference"

    # Loose check vs. full-f32 math (expected bf16 quantization error only).
    ref_f32 = (jnp.maximum(x.reshape(-1, n_embd) @ w1 + b1, 0.0) @ w2 + b2)
    ref_f32 = ref_f32.reshape(B, T, n_embd)
    assert jnp.allclose(out, ref_f32, atol=5e-2, rtol=5e-2), "mismatch vs f32 reference"

    print("KERNEL_OK")
</pallas_src>

<mosaic_0001>
module attributes {stable_mosaic.version = 11 : i64} {
  func.func @ffn_kernel(%arg0: i32, %arg1: memref<16x24xf32, #tpu.memory_space<vmem>>, %arg2: memref<24x96xbf16, #tpu.memory_space<vmem>>, %arg3: memref<1x96xf32, #tpu.memory_space<vmem>>, %arg4: memref<96x24xbf16, #tpu.memory_space<vmem>>, %arg5: memref<1x24xf32, #tpu.memory_space<vmem>>, %arg6: memref<16x24xf32, #tpu.memory_space<vmem>>) attributes {dimension_semantics = [#tpu.dimension_semantics<parallel>], iteration_bounds = array<i64: 1>, scalar_prefetch = 0 : i64, scratch_operands = 0 : i64, tpu.core_type = #tpu.core_type<tc>, window_params = [{transform_indices = @transform_0, window_bounds = array<i64: 16, 24>}, {pipeline_mode = #tpu.pipeline_mode<synchronous>, transform_indices = @transform_1, window_bounds = array<i64: 24, 96>}, {pipeline_mode = #tpu.pipeline_mode<synchronous>, transform_indices = @transform_2, window_bounds = array<i64: 1, 96>}, {pipeline_mode = #tpu.pipeline_mode<synchronous>, transform_indices = @transform_3, window_bounds = array<i64: 96, 24>}, {pipeline_mode = #tpu.pipeline_mode<synchronous>, transform_indices = @transform_4, window_bounds = array<i64: 1, 24>}, {transform_indices = @transform_5, window_bounds = array<i64: 16, 24>}]} {
    %c0 = arith.constant 0 : index
    %c0_0 = arith.constant 0 : index
    %0 = vector.load %arg1[%c0, %c0_0] : memref<16x24xf32, #tpu.memory_space<vmem>>, vector<16x24xf32>
    %1 = arith.truncf %0 : vector<16x24xf32> to vector<16x24xbf16>
    %c0_1 = arith.constant 0 : index
    %c0_2 = arith.constant 0 : index
    %2 = vector.load %arg2[%c0_1, %c0_2] : memref<24x96xbf16, #tpu.memory_space<vmem>>, vector<24x96xbf16>
    %cst = arith.constant dense<0.000000e+00> : vector<16x96xf32>
    %3 = tpu.matmul %1, %2, %cst {dimension_numbers = #tpu.dot_dimension_numbers<[1], [0], [0], [1], [0, 0, 1, 1], [], []>} : vector<16x24xbf16>, vector<24x96xbf16>, vector<16x96xf32> -> vector<16x96xf32>
    %c0_3 = arith.constant 0 : index
    %c0_4 = arith.constant 0 : index
    %4 = vector.load %arg3[%c0_3, %c0_4] : memref<1x96xf32, #tpu.memory_space<vmem>>, vector<1x96xf32>
    %5 = vector.broadcast %4 : vector<1x96xf32> to vector<16x96xf32>
    %6 = arith.addf %3, %5 : vector<16x96xf32>
    %cst_5 = arith.constant 0.000000e+00 : f32
    %7 = vector.broadcast %cst_5 : f32 to vector<16x96xf32>
    %8 = arith.maximumf %6, %7 : vector<16x96xf32>
    %9 = arith.truncf %8 : vector<16x96xf32> to vector<16x96xbf16>
    %c0_6 = arith.constant 0 : index
    %c0_7 = arith.constant 0 : index
    %10 = vector.load %arg4[%c0_6, %c0_7] : memref<96x24xbf16, #tpu.memory_space<vmem>>, vector<96x24xbf16>
    %cst_8 = arith.constant dense<0.000000e+00> : vector<16x24xf32>
    %11 = tpu.matmul %9, %10, %cst_8 {dimension_numbers = #tpu.dot_dimension_numbers<[1], [0], [0], [1], [0, 0, 1, 1], [], []>} : vector<16x96xbf16>, vector<96x24xbf16>, vector<16x24xf32> -> vector<16x24xf32>
    %c0_9 = arith.constant 0 : index
    %c0_10 = arith.constant 0 : index
    %12 = vector.load %arg5[%c0_9, %c0_10] : memref<1x24xf32, #tpu.memory_space<vmem>>, vector<1x24xf32>
    %13 = vector.broadcast %12 : vector<1x24xf32> to vector<16x24xf32>
    %14 = arith.addf %11, %13 : vector<16x24xf32>
    %c0_11 = arith.constant 0 : index
    %c0_12 = arith.constant 0 : index
    %15 = vector.load %arg6[%c0_11, %c0_12] : memref<16x24xf32, #tpu.memory_space<vmem>>, vector<16x24xf32>
    tpu.vector_store %arg6[%c0_11, %c0_12], %14 {strides = array<i32>} : memref<16x24xf32, #tpu.memory_space<vmem>>, vector<16x24xf32>,
    return
  }
  func.func @transform_0(%arg0: i32) -> (i32, i32) {
    %c0_i32 = arith.constant 0 : i32
    %c0_i32_0 = arith.constant 0 : i32
    return %arg0, %c0_i32 : i32, i32
  }
  func.func @transform_1(%arg0: i32) -> (i32, i32) {
    %c0_i32 = arith.constant 0 : i32
    %c0_i32_0 = arith.constant 0 : i32
    %c0_i32_1 = arith.constant 0 : i32
    return %c0_i32, %c0_i32_0 : i32, i32
  }
  func.func @transform_2(%arg0: i32) -> (i32, i32) {
    %c0_i32 = arith.constant 0 : i32
    %c0_i32_0 = arith.constant 0 : i32
    %c0_i32_1 = arith.constant 0 : i32
    return %c0_i32, %c0_i32_0 : i32, i32
  }
  func.func @transform_3(%arg0: i32) -> (i32, i32) {
    %c0_i32 = arith.constant 0 : i32
    %c0_i32_0 = arith.constant 0 : i32
    %c0_i32_1 = arith.constant 0 : i32
    return %c0_i32, %c0_i32_0 : i32, i32
  }
  func.func @transform_4(%arg0: i32) -> (i32, i32) {
    %c0_i32 = arith.constant 0 : i32
    %c0_i32_0 = arith.constant 0 : i32
    %c0_i32_1 = arith.constant 0 : i32
    return %c0_i32, %c0_i32_0 : i32, i32
  }
  func.func @transform_5(%arg0: i32) -> (i32, i32) {
    %c0_i32 = arith.constant 0 : i32
    %c0_i32_0 = arith.constant 0 : i32
    return %arg0, %c0_i32 : i32, i32
  }
}

</mosaic_0001>

<bundles_post_ra>
// kernel: tpu_custom_call.1
= control target key start
LH: loop header
LB: loop body
LE: loop exit
PB: predicated region body
PF: predicated region fallthrough
CT: control target
= control target key end

     0   :  { %v297_v1 = vmov 0.0   ;;  %vm48_vm0 = vcmask 1043456   ;;  %vm298_vm1 = vmmov 0   ;;  %vm44_vm2 = vcmask 195584   ;;  %s383_s0 = inlined_call_operand.vmem [shape: f32[16,24], index: 0, kind: input, shape index: {}]   ;;  %s384_s1 = inlined_call_operand.vmem [shape: bf16[24,96], index: 1, kind: input, shape index: {}]   ;;  %s385_s2 = inlined_call_operand.vmem [shape: f32[1,96], index: 2, kind: input, shape index: {}]   ;;  %s386_s3 = inlined_call_operand.vmem [shape: bf16[96,24], index: 3, kind: input, shape index: {}]   ;;  %s387_s4 = inlined_call_operand.vmem [shape: f32[1,24], index: 4, kind: input, shape index: {}]   ;;  %s388_s5 = inlined_call_operand.hbm [shape: f32[16,24], index: 5, kind: output, shape index: {}]  }
   0x1   :  { %v265_v0 = vld [vmem:[%s384_s1] sm:$0xff]   ;;  %236 = vmatprep.subr.bf16.mxu0 %v297_v1  ;;  %v266_v2 = vld [vmem:[%s384_s1 + $0x8] ss:$0 sps:$4 sm:$0xff]   ;;  %244 = vmatprep.subr.bf16.mxu1 %v297_v1 }
   0x2   :  { %237 = vmatpush3.bf16.msra.mxu0 %v265_v0  ;;  %240 = vmatprep.mubr.msk.bf16.mxu0 %vm298_vm1, %v297_v1  ;;  %v22_v3 = vld [vmem:[%s383_s0] sm:$0xff]  ;;  %v23_v4 = vld [vmem:[%s383_s0 + $0x8] sm:$0xff]  ;;  %v50_v5 = vsel %vm48_vm0, %v266_v2, 0 }
   0x3   :  { %238 = vmatprep.subr.bf16.mxu0 %v297_v1  ;;  %v267_v6 = vld [vmem:[%s386_s3] sm:$0xff]   ;;  %256 = vmatprep.mubr.msk.bf16.mxu1 %vm298_vm1, %v297_v1  ;;  %v24_v7 = vpack.c.bf16 %v23_v4, %v22_v3  ;;  %v268_v8 = vld [vmem:[%s386_s3 + $0x8] sm:$0xff]  }
   0x4   :  { %245 = vmatpush3.bf16.msra.mxu1 %v267_v6 }
   0x5   :  { %246 = vmatprep.subr.bf16.mxu1 %v297_v1 }
   0x6   :  { %239 = vmatpush3.bf16.msra.mxu0 %v50_v5 }
   0x7   :  { %10 = vsyncpa [#allocation3], 0  ;;  %v269_v9 = vld [vmem:[%s386_s3 + $0x10] sm:$0xff]   ;;  %v270_v10 = vld [vmem:[%s386_s3 + $0x18] sm:$0xff]   ;;  %vm151_vm3 = vcmask 785408  }
   0x8   :  { %247 = vmatpush3.bf16.msra.mxu1 %v268_v8  ;;  %v271_v11 = vld [vmem:[%s386_s3 + $0x20] sm:$0xff]   ;;  %v272_v12 = vld [vmem:[%s386_s3 + $0x28] sm:$0xff]   ;;  %s299_s3 = smov [#allocation2]  }
   0x9   :  { %241 = vmatmul.mubr.msk.bf16.vlgmr.msra.gmra.mrb[0].mxu0 %vm44_vm2, %v24_v7  ;;  %248 = vmatprep.subr.bf16.mxu1 %v297_v1  ;;  %v214_v13 = vld [vmem:[%s385_s2] ss:$0 sm:$0xff]  ;;  %s203_s15 = sshll.u32 %s299_s3, 4  ;;  %s204_s15 = int_to_ptr.vmem [resolvable:$true] %s203_s15 }
   0xa   :  { %v218_v23 = vld [vmem:[%s387_s4] ss:$0 sm:$0xff]  ;;  %s273_s2 = scalar_lea.vmem %s204_s15, 256  ;;  %p278_p1 = scmp.lt.s32.totalorder %s204_s15, %s204_s15 }
   0xb   :  { %p274_p0 = scmp.ne.s32.totalorder %s204_s15, %s273_s2  ;;  %p279_p2 = scmp.lt.s32.totalorder %s273_s2, %s273_s2 }
   0xc   :  { %249 = vmatpush3.bf16.msra.mxu1 %v269_v9 }
   0xd   :  { %250 = vmatprep.subr.bf16.mxu1 %v297_v1  ;;  %p280_p3 = por %p279_p2, %p278_p1 }
   0xf   :  { %p281_p4 = pnand %p280_p3, %p274_p0 }
  0x10   :  { %251 = vmatpush3.bf16.msra.mxu1 %v270_v10 }
  0x11   :  { %252 = vmatprep.subr.bf16.mxu1 %v297_v1 }
  0x14   :  { %253 = vmatpush3.bf16.msra.mxu1 %v271_v11 }
  0x15   :  { %254 = vmatprep.subr.bf16.mxu1 %v297_v1 }
  0x18   :  { %255 = vmatpush3.bf16.msra.mxu1 %v272_v12 }
  0xdc   :  { %v86_v14 = vpop.f32.mrb[0].mxu0 }
  0xdd   :  { %v87_v15 = vadd.f32 %v214_v13, %v86_v14  ;;  %v242_v16 = vpop.f32.mrb[1].mxu0 }
  0xde   :  { %v89_v17 = vpop.f32.mrb[2].mxu0 }
  0xdf   :  { %v90_v18 = vadd.f32 %v214_v13, %v89_v17  ;;  %v243_v19 = vpop.f32.mrb[3].mxu0  ;;  %v93_v20 = vmax.f32 %v87_v15, 0.0 }
  0xe1   :  { %v94_v21 = vmax.f32 %v90_v18, 0.0 }
  0xe3   :  { %v95_v22 = vpack.c.bf16 %v94_v21, %v93_v20 }
  0xe5   :  { %257 = vmatmul.mubr.msk.bf16.vlgmr.msra.gmra.mrb[0].mxu1 %vm151_vm3, %v95_v22 }
 0x1b8   :  { %v189_v24 = vpop.f32.mrb[0].mxu1 }
 0x1b9   :  { %v190_v25 = vadd.f32 %v218_v23, %v189_v24  ;;  %v258_v26 = vpop.f32.mrb[1].mxu1 }
 0x1ba   :  { %v192_v27 = vpop.f32.mrb[2].mxu1 }
 0x1bb   :  { %196 = vst.msk [vmem:[#allocation2] sm:$0xff] %vm44_vm2, %v190_v25  ;;  %v193_v28 = vadd.f32 %v218_v23, %v192_v27  ;;  %v259_v29 = vpop.f32.mrb[3].mxu1 }
 0x1bd   :  { %197 = vst.msk [vmem:[#allocation2 + $0x8] sm:$0xff] %vm44_vm2, %v193_v28 }
 0x1be   :  { %284 = shalt.err (!%p281_p4)
}
 0x1bf   :  { %s285_s17 = scalar_lea.hbm %s388_s5, 256 }
 0x1c0   :  { %p286_p5 = scmp.ne.s32.totalorder %s388_s5, %s285_s17  ;;  %p289_p6 = scmp.lt.u32.totalorder %s285_s17, %s388_s5 }
 0x1c2   :  { %p291_p7 = pnand %p289_p6, %p286_p5 }
 0x1c4   :  { %294 = shalt.err (!%p291_p7)
}
 0x1c5   :  { %s300_s22 = smov 128   ;;  %s301_s23 = smov 8  }
 0x1c6   :  { %209 = dma.vmem_to_hbm [thread:$0]  %s204_s15, 256, %s388_s5, [#allocation3], %s300_s22, %s300_s22, %s301_s23  }
 0x1c7   :  { %295 = dma.done.wait [#allocation3], 256  }
 0x1c8   :  { %296 = vsyncadd [#allocation3], 4294967040 }
 0x1c9   :  { %213 = vsyncpa [#allocation3], 1 }

</bundles_post_ra>
